<compile_context>
chip_gen: v6e
topology: v6e:2x2x1
jax: 0.10.0
libtpu: 0.0.40
codegen_flags: <defaults>
</compile_context>

<pallas_src>
import numpy as np
import jax
import jax.numpy as jnp
from jax.experimental import pallas as pl
from jax.experimental.pallas import tpu as pltpu


def _round_up(n, m):
    return ((n + m - 1) // m) * m


def cross_feature_kernel(x_ref, i_ref, j_ref, g_ref, out_ref):
    # x_ref: (TB, F)   -- resident across the inner P-grid axis
    # i_ref/j_ref: (1, TP) int32 pair indices
    # g_ref: (1, TP)   pair dot products <v[i_p], v[j_p]>
    x = x_ref[...]
    F = x.shape[1]
    TP = i_ref.shape[1]

    # Exact gather x[:, i_p] via a one-hot selection matmul: each one-hot
    # column has exactly one nonzero (0/1), so the MXU contraction has a
    # single nonzero term; with HIGHEST precision the result equals the f32
    # gathered value bit-exactly.
    f_iota = jax.lax.broadcasted_iota(jnp.int32, (F, TP), 0)
    oh_i = (f_iota == i_ref[...]).astype(x.dtype)             # (F, TP)
    oh_j = (f_iota == j_ref[...]).astype(x.dtype)             # (F, TP)
    xi = jnp.dot(x, oh_i, preferred_element_type=jnp.float32,
                 precision=jax.lax.Precision.HIGHEST)         # (TB, TP) == x[:, i_p]
    xj = jnp.dot(x, oh_j, preferred_element_type=jnp.float32,
                 precision=jax.lax.Precision.HIGHEST)         # (TB, TP) == x[:, j_p]

    out_ref[...] = (xi * xj * g_ref[...]).astype(out_ref.dtype)


def cross_feature(x, v, *, tb_max=256, tp_max=2048):
    """x: (B, F) float32, v: (E, C) float32 (only the first F rows are used)."""
    B, F = x.shape
    assert F >= 2, "CrossFeature needs at least two feature columns"

    # Static pair enumeration (i outer, j > i inner) == the PyTorch loop order.
    ii, jj = np.triu_indices(F, k=1)
    P = int(ii.shape[0])
    i_idx = jnp.asarray(ii, dtype=jnp.int32)
    j_idx = jnp.asarray(jj, dtype=jnp.int32)

    # g[p] = <v[i_p], v[j_p]>: one-time wrapper-side cost (P x C with C=4).
    g = jnp.sum(v[i_idx] * v[j_idx], axis=1).astype(x.dtype)  # (P,)

    # Tile sizes: lane-dense / 128-aligned pair axis, 8-aligned batch axis.
    # 256 x 2048 f32 blocks keep peak VMEM ~13 MiB at F=300 (double-buffered
    # in/out + in-kernel one-hot temporaries), comfortably under the 32 MiB
    # scoped limit on every current chip while amortizing per-step overhead.
    TB = min(tb_max, _round_up(B, 8))
    TP = min(tp_max, _round_up(P, 128))
    B_pad = _round_up(B, TB)
    P_pad = _round_up(P, TP)

    x_pad = jnp.pad(x, ((0, B_pad - B), (0, 0)))
    g_row = jnp.pad(g, (0, P_pad - P)).reshape(1, P_pad)       # pad -> g=0 => out=0
    i_row = jnp.pad(i_idx, (0, P_pad - P)).reshape(1, P_pad)
    j_row = jnp.pad(j_idx, (0, P_pad - P)).reshape(1, P_pad)

    # P is the inner (fastest) grid axis, so the (TB, F) x block index (b, 0)
    # is unchanged across it and Pallas skips the re-DMA.
    grid = (B_pad // TB, P_pad // TP)

    out = pl.pallas_call(
        cross_feature_kernel,
        out_shape=jax.ShapeDtypeStruct((B_pad, P_pad), x.dtype),
        grid=grid,
        in_specs=[
            pl.BlockSpec((TB, F), lambda b, p: (b, 0)),     # x: revisited over p
            pl.BlockSpec((1, TP), lambda b, p: (0, p)),     # i indices
            pl.BlockSpec((1, TP), lambda b, p: (0, p)),     # j indices
            pl.BlockSpec((1, TP), lambda b, p: (0, p)),     # pair dot products
        ],
        out_specs=pl.BlockSpec((TB, TP), lambda b, p: (b, p)),
        compiler_params=pltpu.CompilerParams(
            dimension_semantics=("parallel", "parallel"),
            vmem_limit_bytes=32 * 1024 * 1024,
        ),
    )(x_pad, i_row, j_row, g_row)

    return out[:B, :P]


if __name__ == "__main__":
    key = jax.random.PRNGKey(0)
    k_v, k_x = jax.random.split(key)

    B, F = 2, 8          # small feature count (module supports up to E=300)
    E, C = 300, 4        # parameter shapes from __init__

    v = jax.random.uniform(k_v, (E, C), dtype=jnp.float32)   # torch.rand analog
    x = jax.random.normal(k_x, (B, F), dtype=jnp.float32)

    out = jax.block_until_ready(cross_feature(x, v))

    # Reference (mirrors the PyTorch double loop, then .T)
    ref_cols = []
    for i in range(F - 1):
        for j in range(i + 1, F):
            ref_cols.append(x[:, i] * x[:, j] * jnp.dot(v[i], v[j]))
    ref = jnp.stack(ref_cols, axis=0).T                       # (B, P)

    assert out.shape == (B, F * (F - 1) // 2)
    assert jnp.allclose(out, ref, atol=1e-4, rtol=1e-4), "mismatch vs reference"
    print("KERNEL_OK")
</pallas_src>

<mosaic_0001>
module attributes {stable_mosaic.version = 11 : i64} {
  func.func @cross_feature_kernel(%arg0: i32, %arg1: i32, %arg2: memref<8x8xf32, #tpu.memory_space<vmem>>, %arg3: memref<1x128xi32, #tpu.memory_space<vmem>>, %arg4: memref<1x128xi32, #tpu.memory_space<vmem>>, %arg5: memref<1x128xf32, #tpu.memory_space<vmem>>, %arg6: memref<8x128xf32, #tpu.memory_space<vmem>>) attributes {dimension_semantics = [#tpu.dimension_semantics<parallel>, #tpu.dimension_semantics<parallel>], iteration_bounds = array<i64: 1, 1>, scalar_prefetch = 0 : i64, scratch_operands = 0 : i64, tpu.core_type = #tpu.core_type<tc>, window_params = [{transform_indices = @transform_0, window_bounds = array<i64: 8, 8>}, {transform_indices = @transform_1, window_bounds = array<i64: 1, 128>}, {transform_indices = @transform_2, window_bounds = array<i64: 1, 128>}, {transform_indices = @transform_3, window_bounds = array<i64: 1, 128>}, {transform_indices = @transform_4, window_bounds = array<i64: 8, 128>}]} {
    %c0 = arith.constant 0 : index
    %c0_0 = arith.constant 0 : index
    %0 = vector.load %arg2[%c0, %c0_0] : memref<8x8xf32, #tpu.memory_space<vmem>>, vector<8x8xf32>
    %1 = tpu.iota {dimensions = array<i32: 0>} : vector<8x128xi32>
    %c0_1 = arith.constant 0 : index
    %c0_2 = arith.constant 0 : index
    %2 = vector.load %arg3[%c0_1, %c0_2] : memref<1x128xi32, #tpu.memory_space<vmem>>, vector<1x128xi32>
    %3 = vector.broadcast %2 : vector<1x128xi32> to vector<8x128xi32>
    %4 = arith.cmpi eq, %1, %3 : vector<8x128xi32>
    %5 = arith.extui %4 : vector<8x128xi1> to vector<8x128xi32>
    %6 = arith.sitofp %5 : vector<8x128xi32> to vector<8x128xf32>
    %c0_3 = arith.constant 0 : index
    %c0_4 = arith.constant 0 : index
    %7 = vector.load %arg4[%c0_3, %c0_4] : memref<1x128xi32, #tpu.memory_space<vmem>>, vector<1x128xi32>
    %8 = vector.broadcast %7 : vector<1x128xi32> to vector<8x128xi32>
    %9 = arith.cmpi eq, %1, %8 : vector<8x128xi32>
    %10 = arith.extui %9 : vector<8x128xi1> to vector<8x128xi32>
    %11 = arith.sitofp %10 : vector<8x128xi32> to vector<8x128xf32>
    %cst = arith.constant dense<0.000000e+00> : vector<8x128xf32>
    %12 = tpu.matmul %0, %6, %cst {dimension_numbers = #tpu.dot_dimension_numbers<[1], [0], [0], [1], [0, 0, 1, 1], [], []>, precision = #tpu.contract_precision<fp32>} : vector<8x8xf32>, vector<8x128xf32>, vector<8x128xf32> -> vector<8x128xf32>
    %cst_5 = arith.constant dense<0.000000e+00> : vector<8x128xf32>
    %13 = tpu.matmul %0, %11, %cst_5 {dimension_numbers = #tpu.dot_dimension_numbers<[1], [0], [0], [1], [0, 0, 1, 1], [], []>, precision = #tpu.contract_precision<fp32>} : vector<8x8xf32>, vector<8x128xf32>, vector<8x128xf32> -> vector<8x128xf32>
    %14 = arith.mulf %12, %13 : vector<8x128xf32>
    %c0_6 = arith.constant 0 : index
    %c0_7 = arith.constant 0 : index
    %15 = vector.load %arg5[%c0_6, %c0_7] : memref<1x128xf32, #tpu.memory_space<vmem>>, vector<1x128xf32>
    %16 = vector.broadcast %15 : vector<1x128xf32> to vector<8x128xf32>
    %17 = arith.mulf %14, %16 : vector<8x128xf32>
    %c0_8 = arith.constant 0 : index
    %c0_9 = arith.constant 0 : index
    %18 = vector.load %arg6[%c0_8, %c0_9] : memref<8x128xf32, #tpu.memory_space<vmem>>, vector<8x128xf32>
    tpu.vector_store %arg6[%c0_8, %c0_9], %17 {strides = array<i32>} : memref<8x128xf32, #tpu.memory_space<vmem>>, vector<8x128xf32>,
    return
  }
  func.func @transform_0(%arg0: i32, %arg1: i32) -> (i32, i32) {
    %c0_i32 = arith.constant 0 : i32
    %c0_i32_0 = arith.constant 0 : i32
    return %arg0, %c0_i32 : i32, i32
  }
  func.func @transform_1(%arg0: i32, %arg1: i32) -> (i32, i32) {
    %c0_i32 = arith.constant 0 : i32
    %c0_i32_0 = arith.constant 0 : i32
    return %c0_i32, %arg1 : i32, i32
  }
  func.func @transform_2(%arg0: i32, %arg1: i32) -> (i32, i32) {
    %c0_i32 = arith.constant 0 : i32
    %c0_i32_0 = arith.constant 0 : i32
    return %c0_i32, %arg1 : i32, i32
  }
  func.func @transform_3(%arg0: i32, %arg1: i32) -> (i32, i32) {
    %c0_i32 = arith.constant 0 : i32
    %c0_i32_0 = arith.constant 0 : i32
    return %c0_i32, %arg1 : i32, i32
  }
  func.func @transform_4(%arg0: i32, %arg1: i32) -> (i32, i32) {
    %c0_i32 = arith.constant 0 : i32
    return %arg0, %arg1 : i32, i32
  }
}

</mosaic_0001>

<bundles_post_ra>
// kernel: tpu_custom_call.1
= control target key start
LH: loop header
LB: loop body
LE: loop exit
PB: predicated region body
PF: predicated region fallthrough
CT: control target
= control target key end

     0   :  { %9 = vsyncpa [#allocation3], 0  ;;  %s1217_s0 = inlined_call_operand.hbm [shape: f32[8,8], index: 0, kind: input, shape index: {}]   ;;  %s1218_s1 = inlined_call_operand.vmem [shape: s32[1,128], index: 1, kind: input, shape index: {}]   ;;  %s1219_s2 = inlined_call_operand.vmem [shape: s32[1,128], index: 2, kind: input, shape index: {}]   ;;  %s1220_s3 = inlined_call_operand.vmem [shape: f32[1,128], index: 3, kind: input, shape index: {}]   ;;  %s1221_s4 = inlined_call_operand.hbm [shape: f32[8,128], index: 4, kind: output, shape index: {}]  }
   0x1   :  { %10 = vsyncpa [#allocation4], 0  ;;  %s1114_s15 = smov [#allocation2]  }
   0x2   :  { %s17_s16 = sshll.u32 %s1114_s15, 4  ;;  %s18_s16 = int_to_ptr.vmem [resolvable:$true] %s17_s16 }
   0x3   :  { %s1078_s17 = scalar_lea.vmem %s18_s16, 128  ;;  %p1083_p1 = scmp.lt.s32.totalorder %s18_s16, %s18_s16 }
   0x4   :  { %p1079_p0 = scmp.ne.s32.totalorder %s18_s16, %s1078_s17  ;;  %p1084_p2 = scmp.lt.s32.totalorder %s1078_s17, %s1078_s17 }
   0x6   :  { %p1085_p3 = por %p1084_p2, %p1083_p1 }
   0x8   :  { %p1086_p4 = pnand %p1085_p3, %p1079_p0 }
   0xa   :  { %1089 = shalt.err (!%p1086_p4)
}
   0xb   :  { %20 = dma.hbm_to_vmem [thread:$0]  %s1217_s0, 128, %s18_s16, [#allocation3]  }
   0xc   :  { %1110 = dma.done.wait [#allocation3], 128  }
   0xd   :  { %1111 = vsyncadd [#allocation3], 4294967168  ;;  %v31_v0 = vlaneseq  ;;  %v1115_v1 = vmov 0.0   ;;  %vm1116_vm0 = vmmov 0   ;;  %vm49_vm1 = vcmask 64512   ;;  %v30_v4 = vld [vmem:[#allocation2] sm:$0xff] }
   0xe   :  { %1005 = vmatprep.subr.mxu0 %v1115_v1  ;;  %1010 = vmatprep.subr.mxu1 %v1115_v1  ;;  %v970_v3 = vld [vmem:[%s1218_s1] ss:$0 sm:$0xff]  ;;  %v51_v6 = vsel %vm49_vm1, %v30_v4, 0  ;;  %v1117_v7 = vmov 1.0   ;;  %s1118_s23 = smov [#allocation5]  }
   0xf   :  { %1007 = vmatprep.mubr.msk.f32.mxu0 %vm1116_vm0, %v1115_v1  ;;  %1012 = vmatprep.mubr.msk.f32.mxu1 %vm1116_vm0, %v1115_v1  ;;  %v1153_v2 = vshrl.u32 %v31_v0, 7  ;;  %v972_v5 = vld [vmem:[%s1219_s2] ss:$0 sm:$0xff]  ;;  %v119_v9 = vand.u32 4294901760, %v51_v6  ;;  %s961_s24 = sshll.u32 %s1118_s23, 4  ;;  %s962_s24 = int_to_ptr.vmem [resolvable:$true] %s961_s24 }
  0x10   :  { %v980_v57 = vld [vmem:[%s1220_s3] ss:$0 sm:$0xff]  ;;  %s1090_s25 = scalar_lea.vmem %s962_s24, 128  ;;  %p1095_p6 = scmp.lt.s32.totalorder %s962_s24, %s962_s24 }
  0x11   :  { %vm38_vm2 = vcmp.eq.s32.totalorder %v1153_v2, %v970_v3  ;;  %vm46_vm3 = vcmp.eq.s32.totalorder %v1153_v2, %v972_v5  ;;  %v120_v12 = vsub.f32 %v51_v6, %v119_v9  ;;  %p1091_p5 = scmp.ne.s32.totalorder %s962_s24, %s1090_s25  ;;  %p1096_p7 = scmp.lt.s32.totalorder %s1090_s25, %s1090_s25 }
  0x12   :  { %1006 = vmatpush3.msk.msra.mxu0 %vm38_vm2, %v1117_v7  ;;  %v971_v8 = vsel %vm38_vm2, 1.0, %v1115_v1  ;;  %v973_v11 = vsel %vm46_vm3, 1.0, %v1115_v1 }
  0x13   :  { %v161_v10 = vsub.f32 %v971_v8, %v971_v8  ;;  %1015 = vmatprep.subr.mxu0 %v1115_v1  ;;  %v121_v14 = vand.u32 4294901760, %v120_v12  ;;  %v607_v15 = vsub.f32 %v973_v11, %v973_v11  ;;  %p1097_p8 = por %p1096_p7, %p1095_p6 }
  0x15   :  { %v162_v13 = vand.u32 4294901760, %v161_v10  ;;  %v122_v17 = vsub.f32 %v120_v12, %v121_v14  ;;  %v608_v20 = vand.u32 4294901760, %v607_v15  ;;  %p1098_p9 = pnand %p1097_p8, %p1091_p5 }
  0x17   :  { %v163_v16 = vsub.f32 %v161_v10, %v162_v13  ;;  %v123_v19 = vand.u32 4294901760, %v122_v17  ;;  %v609_v21 = vsub.f32 %v607_v15, %v608_v20 }
  0x19   :  { %v164_v18 = vand.u32 4294901760, %v163_v16  ;;  %1008 = vmatmul.mubr.f32.vlgmr.msra.gmra.mxu0 %v123_v19  ;;  %v610_v22 = vand.u32 4294901760, %v609_v21 }
  0x1a   :  { %1016 = vmatpush3.msra.mxu0 %v161_v10  ;;  %1017 = vmatprep.mubr.msk.f32.mxu0 %vm1116_vm0, %v1115_v1 }
  0x1b   :  { %1011 = vmatpush3.msra.mxu1 %v164_v18  ;;  %1025 = vmatprep.subr.mxu0 %v1115_v1 }
  0x1c   :  { %1013 = vmatmul.mubr.f32.vlgmr.msra.gmra.mxu1 %v119_v9  ;;  %1020 = vmatprep.subr.mxu1 %v1115_v1 }
  0x1d   :  { %1021 = vmatpush3.msk.msra.mxu1 %vm38_vm2, %v1117_v7  ;;  %1022 = vmatprep.mubr.msk.f32.mxu1 %vm1116_vm0, %v1115_v1 }
  0x1e   :  { %1018 = vmatmul.mubr.f32.vlgmr.msra.gmra.mxu0 %v120_v12  ;;  %1030 = vmatprep.subr.mxu1 %v1115_v1 }
  0x1f   :  { %1026 = vmatpush3.msra.mxu0 %v162_v13  ;;  %1027 = vmatprep.mubr.msk.f32.mxu0 %vm1116_vm0, %v1115_v1 }
  0x20   :  { %1023 = vmatmul.mubr.f32.vlgmr.msra.gmra.mxu1 %v121_v14  ;;  %1035 = vmatprep.subr.mxu0 %v1115_v1 }
  0x21   :  { %1031 = vmatpush3.msk.msra.mxu1 %vm38_vm2, %v1117_v7  ;;  %1032 = vmatprep.mubr.msk.f32.mxu1 %vm1116_vm0, %v1115_v1 }
  0x22   :  { %1028 = vmatmul.mubr.f32.vlgmr.msra.gmra.mxu0 %v119_v9  ;;  %1040 = vmatprep.subr.mxu1 %v1115_v1 }
  0x23   :  { %1036 = vmatpush3.msk.msra.mxu0 %vm46_vm3, %v1117_v7  ;;  %1037 = vmatprep.mubr.msk.f32.mxu0 %vm1116_vm0, %v1115_v1 }
  0x24   :  { %1033 = vmatmul.mubr.f32.vlgmr.msra.gmra.mxu1 %v119_v9  ;;  %1045 = vmatprep.subr.mxu0 %v1115_v1 }
  0x25   :  { %1041 = vmatpush3.msra.mxu1 %v610_v22  ;;  %1042 = vmatprep.mubr.msk.f32.mxu1 %vm1116_vm0, %v1115_v1 }
  0x26   :  { %1038 = vmatmul.mubr.f32.vlgmr.msra.gmra.mxu0 %v123_v19  ;;  %1050 = vmatprep.subr.mxu1 %v1115_v1 }
  0x27   :  { %1046 = vmatpush3.msra.mxu0 %v607_v15  ;;  %1047 = vmatprep.mubr.msk.f32.mxu0 %vm1116_vm0, %v1115_v1 }
  0x28   :  { %1043 = vmatmul.mubr.f32.vlgmr.msra.gmra.mxu1 %v119_v9  ;;  %1055 = vmatprep.subr.mxu0 %v1115_v1 }
  0x29   :  { %1051 = vmatpush3.msk.msra.mxu1 %vm46_vm3, %v1117_v7  ;;  %1052 = vmatprep.mubr.msk.f32.mxu1 %vm1116_vm0, %v1115_v1 }
  0x2a   :  { %1048 = vmatmul.mubr.f32.vlgmr.msra.gmra.mxu0 %v120_v12  ;;  %1060 = vmatprep.subr.mxu1 %v1115_v1 }
  0x2b   :  { %1056 = vmatpush3.msra.mxu0 %v608_v20  ;;  %1057 = vmatprep.mubr.msk.f32.mxu0 %vm1116_vm0, %v1115_v1 }
  0x2c   :  { %1053 = vmatmul.mubr.f32.vlgmr.msra.gmra.mxu1 %v121_v14 }
  0x2d   :  { %1061 = vmatpush3.msk.msra.mxu1 %vm46_vm3, %v1117_v7  ;;  %1062 = vmatprep.mubr.msk.f32.mxu1 %vm1116_vm0, %v1115_v1 }
  0x2e   :  { %1058 = vmatmul.mubr.f32.vlgmr.msra.gmra.mxu0 %v119_v9 }
  0x30   :  { %1063 = vmatmul.mubr.f32.vlgmr.msra.gmra.mxu1 %v119_v9 }
  0xd9   :  { %v125_v23 = vpop.f32.mrf.mxu0 }
  0xdb   :  { %v1009_v25 = vpop.f32.mrf.mxu0 }
  0xdc   :  { %v201_v24 = vpop.f32.mrf.mxu1 }
  0xdd   :  { %v202_v33 = vadd.f32 %v201_v24, %v125_v23 }
  0xde   :  { %v1014_v26 = vpop.f32.mrf.mxu1  ;;  %v275_v27 = vpop.f32.mrf.mxu0 }
  0xdf   :  { %v276_v36 = vadd.f32 %v275_v27, %v202_v33 }
  0xe0   :  { %v349_v28 = vpop.f32.mrf.mxu1  ;;  %v1019_v29 = vpop.f32.mrf.mxu0 }
  0xe1   :  { %v350_v41 = vadd.f32 %v349_v28, %v276_v36 }
  0xe2   :  { %v1024_v30 = vpop.f32.mrf.mxu1  ;;  %v423_v31 = vpop.f32.mrf.mxu0 }
  0xe3   :  { %v424_v48 = vadd.f32 %v423_v31, %v350_v41 }
  0xe4   :  { %v495_v32 = vpop.f32.mrf.mxu1  ;;  %v1029_v34 = vpop.f32.mrf.mxu0 }
  0xe5   :  { %v496_v55 = vadd.f32 %v495_v32, %v424_v48 }
  0xe6   :  { %v1034_v35 = vpop.f32.mrf.mxu1  ;;  %v571_v37 = vpop.f32.mrf.mxu0 }
  0xe8   :  { %v647_v38 = vpop.f32.mrf.mxu1  ;;  %v1039_v39 = vpop.f32.mrf.mxu0 }
  0xe9   :  { %v648_v42 = vadd.f32 %v647_v38, %v571_v37 }
  0xea   :  { %v1044_v40 = vpop.f32.mrf.mxu1  ;;  %v721_v43 = vpop.f32.mrf.mxu0 }
  0xeb   :  { %v722_v45 = vadd.f32 %v721_v43, %v648_v42 }
  0xec   :  { %v795_v44 = vpop.f32.mrf.mxu1  ;;  %v1049_v46 = vpop.f32.mrf.mxu0 }
  0xed   :  { %v796_v49 = vadd.f32 %v795_v44, %v722_v45 }
  0xee   :  { %v1054_v47 = vpop.f32.mrf.mxu1  ;;  %v869_v50 = vpop.f32.mrf.mxu0 }
  0xef   :  { %v870_v52 = vadd.f32 %v869_v50, %v796_v49 }
  0xf0   :  { %v941_v51 = vpop.f32.mrf.mxu1  ;;  %v1059_v53 = vpop.f32.mrf.mxu0 }
  0xf1   :  { %v942_v56 = vadd.f32 %v941_v51, %v870_v52 }
  0xf2   :  { %v1064_v54 = vpop.f32.mrf.mxu1 }
  0xf3   :  { %v945_v58 = vmul.f32 %v942_v56, %v496_v55 }
  0xf5   :  { %v953_v59 = vmul.f32 %v980_v57, %v945_v58 }
  0xf7   :  { %954 = vst [vmem:[#allocation5] sm:$0xff] %v953_v59 }
  0xf8   :  { %1101 = shalt.err (!%p1098_p9)
}
  0xf9   :  { %964 = dma.vmem_to_hbm [thread:$0]  %s962_s24, 128, %s1221_s4, [#allocation4]  }
  0xfa   :  { %1112 = dma.done.wait [#allocation4], 128  }
  0xfb   :  { %1113 = vsyncadd [#allocation4], 4294967168 }
  0xfc   :  { %968 = vsyncpa [#allocation3], 1 }
  0xfd   :  { %969 = vsyncpa [#allocation4], 1 }

</bundles_post_ra>
